<compile_context>
chip_gen: v7x
topology: tpu7x:2x2x1
jax: 0.10.0
libtpu: 0.0.40
codegen_flags: <defaults>
</compile_context>

<pallas_src>
import jax
import jax.numpy as jnp
from jax.experimental import pallas as pl
from jax.experimental.pallas import tpu as pltpu

EPS = 1e-5  # nn.BatchNorm1d default eps


def _round_up(a, b):
    return (a + b - 1) // b * b


def _vmem_limit_bytes():
    # ~80% of physical VMEM: ~102 MiB on v5e/v6e (128 MiB), ~51 MiB on v7x (64 MiB).
    try:
        return int(pltpu.get_tpu_info().vmem_capacity_bytes * 0.8)
    except Exception:  # pragma: no cover - conservative fallback
        return 48 * 1024 * 1024


def _make_stats_kernel(T, Tt, K, Cp, cdt):
    """Call 1: conv1 (im2col, one dot) + per-tile BN partial stats."""

    def kernel(xa_ref, xb_ref, w1_ref, stats_ref, xw_ref, col_ref):
        # xa: (1, Tt, Cp) f32 main tile of padded x.   xb: (1, Hb1, Cp) f32 halo.
        # w1: (K*Cp, Cp) cdt im2col conv1 weight.      stats: (1, 1, 2, Cp) f32.
        # xw: (Tt + Hb1, Cp) cdt scratch.              col: (Tt, K*Cp) cdt scratch.
        xw_ref[:Tt, :] = xa_ref[...].reshape(Tt, Cp).astype(cdt)
        xw_ref[Tt:, :] = xb_ref[...].reshape(-1, Cp).astype(cdt)
        for k in range(K):                          # K shifted unit-stride copies
            col_ref[:, k * Cp:(k + 1) * Cp] = xw_ref[k:k + Tt, :]
        # one tall matmul (contraction depth K*Cp), f32 MXU accumulation
        y = jnp.dot(col_ref[...], w1_ref[...], preferred_element_type=jnp.float32)
        # mask rows beyond the true sequence length (tile round-up padding)
        t0 = pl.program_id(1) * Tt
        row = jax.lax.broadcasted_iota(jnp.int32, (Tt, 1), 0)
        y = jnp.where(row + t0 < T, y, 0.0)
        # one-pass BN partial stats in f32: sum and sum-of-squares
        s1 = jnp.sum(y, axis=0, keepdims=True)
        s2 = jnp.sum(y * y, axis=0, keepdims=True)
        stats_ref[...] = jnp.concatenate([s1, s2], axis=0).reshape(1, 1, 2, Cp)

    return kernel


def _make_apply_kernel(Ttc2, Ut, Th, K, Cp, stride, left, cdt):
    """Call 2: conv1 (recompute) + BN affine + ReLU + residual + conv2."""
    n_a = min(Th, Ttc2 - left)   # residual rows taken from the main block
    n_b = Th - n_a               # residual rows taken from the halo block

    def kernel(xa_ref, xb_ref, w1_ref, w2_ref, scale_ref, shift_ref, b2_ref,
               out_ref, xw_ref, col_ref, h_ref, hcol_ref):
        # xa: (1, Ttc2, Cp) f32.  xb: (1, Hb2, Cp) f32 halo.
        # w1/w2: (K*Cp, Cp) cdt.  scale/shift/b2: (1, Cp) f32.  out: (1, Ut, Cp) f32.
        # xw: (Ttc2+Hb2, Cp) cdt.  col: (Th, K*Cp) cdt.  h: (Th, Cp) cdt.
        # hcol: (Ut, K*Cp) cdt.
        xw_ref[:Ttc2, :] = xa_ref[...].reshape(Ttc2, Cp).astype(cdt)
        xw_ref[Ttc2:, :] = xb_ref[...].reshape(-1, Cp).astype(cdt)
        for k in range(K):
            col_ref[:, k * Cp:(k + 1) * Cp] = xw_ref[k:k + Th, :]
        # conv1 recomputed for this tile (one dot, K-tap fused contraction)
        y = jnp.dot(col_ref[...], w1_ref[...], preferred_element_type=jnp.float32)

        # residual x stays f32 and is re-read from the input refs right here
        # (short live range; no big f32 value held across the matmuls)
        xres = xa_ref[0:1, left:left + n_a, :].reshape(n_a, Cp)
        if n_b > 0:
            xres = jnp.concatenate(
                [xres, xb_ref[0:1, :n_b, :].reshape(n_b, Cp)], axis=0)

        # fused BN affine + ReLU + residual: single store into the h scratch
        h = jnp.maximum(y * scale_ref[...] + shift_ref[...], 0.0) + xres
        h_ref[...] = h.astype(cdt)

        # conv2 im2col: K strided reads (built once), then ONE dot.
        # TODO(synk): for stride==2 a parity de-interleaved h layout would make
        # these reads unit-stride (removes the per-tap relayout copy).
        for k in range(K):
            sl = pl.ds(k, Ut) if stride == 1 else pl.ds(k, Ut, stride=stride)
            hcol_ref[:, k * Cp:(k + 1) * Cp] = h_ref[sl, :]
        out = jnp.dot(hcol_ref[...], w2_ref[...], preferred_element_type=jnp.float32)
        out_ref[...] = (out + b2_ref[...]).reshape(1, Ut, Cp)

    return kernel


def residual_downsample_block(x_nct, params, *, stride, kernel_size=4,
                              compute_dtype=jnp.bfloat16, time_tile=512):
    """x_nct: (B, C, T) float32 (PyTorch NCT).  Returns (B, C, T_out)."""
    w1, b1, gamma, beta, w2, b2 = params
    # conv1 bias is cancelled exactly by training-mode BatchNorm mean-subtraction.
    # TODO(synk): re-add b1 if this block is ever run in eval mode (running stats).
    del b1
    B, C, T = x_nct.shape
    K = kernel_size
    s = stride
    assert w1.shape == (C, C, K) and w2.shape == (C, C, K), "residual needs Cin==Cout"
    assert T >= K, "conv2 ('valid') needs T >= kernel_size"
    cdt = compute_dtype

    left = (K - 1) // 2                      # PyTorch 'same' split for even K
    U = (T - K) // s + 1                     # conv2 output length
    Cp = _round_up(C, 128)                   # lane-dense channel count

    # ---- call-1 tiling: conv1-output time tiles of Tt rows -------------------
    Hb1 = _round_up(max(K - 1, 1), 8)        # halo block (conv1 taps)
    Tt = min(_round_up(T, Hb1), _round_up(time_tile, Hb1))
    n_t = -(-T // Tt)
    # ---- call-2 tiling: conv2-output tiles of Ut rows -------------------------
    Hb2 = _round_up(max(2 * K - 1 - s, 1), 8)   # halo (conv1 + conv2 taps)
    Ut = min(_round_up(U, Hb2), _round_up(max(time_tile // s, Hb2), Hb2))
    n_u = -(-U // Ut)
    Ttc2 = Ut * s                            # padded-x rows consumed per tile
    Th = (Ut - 1) * s + K                    # h rows needed per tile

    # padded-x length: 'same' pad + tile round-up + halo blocks, all in bounds
    Tp = max(n_t * Tt + Hb1, n_u * Ttc2 + Hb2, T + K - 1)

    # ---- glue: NCT -> channels-last, zero pad channels & time -----------------
    # TODO(synk): keep activations channels-last (B,T,C) end-to-end in the
    # surrounding model so this transpose/pad HBM prep pass disappears.
    x_btc = jnp.transpose(x_nct, (0, 2, 1)).astype(jnp.float32)
    x_pad = jnp.zeros((B, Tp, Cp), jnp.float32)
    x_pad = x_pad.at[:, left:left + T, :C].set(x_btc)

    def prep_w(w):                           # (C_out, C_in, K) -> (K*Cp, Cp)
        wt = jnp.transpose(w, (2, 1, 0)).astype(jnp.float32)
        wt = jnp.pad(wt, ((0, 0), (0, Cp - C), (0, Cp - C)))
        return wt.reshape(K * Cp, Cp).astype(cdt)

    w1_mat, w2_mat = prep_w(w1), prep_w(w2)
    gamma_p = jnp.pad(gamma.astype(jnp.float32), (0, Cp - C))
    beta_p = jnp.pad(beta.astype(jnp.float32), (0, Cp - C))
    b2_p = jnp.pad(b2.astype(jnp.float32), (0, Cp - C)).reshape(1, Cp)

    wbytes = jnp.dtype(cdt).itemsize
    vmem_limit = _vmem_limit_bytes()

    # ---------------- call 1: conv1 + BN partial statistics --------------------
    flops1 = 2 * B * n_t * Tt * K * Cp * Cp
    bytes1 = (B * n_t * (Tt + Hb1) * Cp * 4 + K * Cp * Cp * wbytes
              + B * n_t * 2 * Cp * 4)
    partial = pl.pallas_call(
        _make_stats_kernel(T, Tt, K, Cp, cdt),
        out_shape=jax.ShapeDtypeStruct((B, n_t, 2, Cp), jnp.float32),
        grid_spec=pltpu.PrefetchScalarGridSpec(
            num_scalar_prefetch=0,
            grid=(B, n_t),
            in_specs=[
                pl.BlockSpec((1, Tt, Cp), lambda b, j: (b, j, 0)),
                pl.BlockSpec((1, Hb1, Cp),
                             lambda b, j: (b, (j + 1) * (Tt // Hb1), 0)),
                pl.BlockSpec((K * Cp, Cp), lambda b, j: (0, 0)),
            ],
            out_specs=pl.BlockSpec((1, 1, 2, Cp), lambda b, j: (b, j, 0, 0)),
            scratch_shapes=[pltpu.VMEM((Tt + Hb1, Cp), cdt),
                            pltpu.VMEM((Tt, K * Cp), cdt)],
        ),
        compiler_params=pltpu.CompilerParams(
            dimension_semantics=("parallel", "parallel"),
            vmem_limit_bytes=vmem_limit),
        cost_estimate=pl.CostEstimate(flops=flops1, transcendentals=0,
                                      bytes_accessed=bytes1),
    )(x_pad, x_pad, w1_mat)

    # ---------------- tiny combine: global BN stats over (B, T) ----------------
    sums = jnp.sum(partial, axis=(0, 1))             # (2, Cp), f32
    count = float(B * T)
    mean = sums[0] / count
    var = jnp.maximum(sums[1] / count - mean * mean, 0.0)   # one-pass var, f32
    scale_v = gamma_p * jax.lax.rsqrt(var + EPS)
    shift_v = beta_p - mean * scale_v
    scale = scale_v.reshape(1, Cp)
    shift = shift_v.reshape(1, Cp)

    # ---------------- call 2: conv1(recompute) + BN/ReLU/residual + conv2 ------
    flops2 = 2 * B * n_u * (Th + Ut) * K * Cp * Cp
    bytes2 = (B * n_u * (Ttc2 + Hb2) * Cp * 4 + 2 * K * Cp * Cp * wbytes
              + B * n_u * Ut * Cp * 4)
    out_pad = pl.pallas_call(
        _make_apply_kernel(Ttc2, Ut, Th, K, Cp, s, left, cdt),
        out_shape=jax.ShapeDtypeStruct((B, n_u * Ut, Cp), jnp.float32),
        grid_spec=pltpu.PrefetchScalarGridSpec(
            num_scalar_prefetch=0,
            grid=(B, n_u),
            in_specs=[
                pl.BlockSpec((1, Ttc2, Cp), lambda b, u: (b, u, 0)),
                pl.BlockSpec((1, Hb2, Cp),
                             lambda b, u: (b, (u + 1) * (Ttc2 // Hb2), 0)),
                pl.BlockSpec((K * Cp, Cp), lambda b, u: (0, 0)),
                pl.BlockSpec((K * Cp, Cp), lambda b, u: (0, 0)),
                pl.BlockSpec((1, Cp), lambda b, u: (0, 0)),
                pl.BlockSpec((1, Cp), lambda b, u: (0, 0)),
                pl.BlockSpec((1, Cp), lambda b, u: (0, 0)),
            ],
            out_specs=pl.BlockSpec((1, Ut, Cp), lambda b, u: (b, u, 0)),
            scratch_shapes=[pltpu.VMEM((Ttc2 + Hb2, Cp), cdt),
                            pltpu.VMEM((Th, K * Cp), cdt),
                            pltpu.VMEM((Th, Cp), cdt),
                            pltpu.VMEM((Ut, K * Cp), cdt)],
        ),
        compiler_params=pltpu.CompilerParams(
            dimension_semantics=("parallel", "parallel"),
            vmem_limit_bytes=vmem_limit),
        cost_estimate=pl.CostEstimate(flops=flops2, transcendentals=0,
                                      bytes_accessed=bytes2),
    )(x_pad, x_pad, w1_mat, w2_mat, scale, shift, b2_p)

    # back to NCT; drop channel lane-padding and tile round-up rows
    return jnp.transpose(out_pad[:, :U, :C], (0, 2, 1))


def _reference(x_nct, params, *, stride, kernel_size=4):
    """Pure-JAX reference matching PyTorch semantics (for validation)."""
    w1, b1, gamma, beta, w2, b2 = params
    K = kernel_size
    left = (K - 1) // 2
    right = (K - 1) - left
    dn = ("NCH", "OIH", "NCH")
    y = jax.lax.conv_general_dilated(x_nct, w1, window_strides=(1,),
                                     padding=[(left, right)],
                                     dimension_numbers=dn)
    y = y + b1[None, :, None]
    mu = jnp.mean(y, axis=(0, 2), keepdims=True)
    var = jnp.mean((y - mu) ** 2, axis=(0, 2), keepdims=True)
    y = (y - mu) / jnp.sqrt(var + EPS) * gamma[None, :, None] + beta[None, :, None]
    y = jnp.maximum(y, 0.0) + x_nct
    y = jax.lax.conv_general_dilated(y, w2, window_strides=(stride,),
                                     padding=[(0, 0)], dimension_numbers=dn)
    return y + b2[None, :, None]


def _make_params(key, C, K):
    k_w1, k_b1, k_w2, k_b2, k_g, k_be = jax.random.split(key, 6)
    w1 = 0.1 * jax.random.normal(k_w1, (C, C, K), jnp.float32)     # conv1.weight
    b1 = 0.1 * jax.random.normal(k_b1, (C,), jnp.float32)          # conv1.bias
    gamma = 1.0 + 0.1 * jax.random.normal(k_g, (C,), jnp.float32)  # bn1.weight
    beta = 0.1 * jax.random.normal(k_be, (C,), jnp.float32)        # bn1.bias
    w2 = 0.1 * jax.random.normal(k_w2, (C, C, K), jnp.float32)     # conv2.weight
    b2 = 0.1 * jax.random.normal(k_b2, (C,), jnp.float32)          # conv2.bias
    return (w1, b1, gamma, beta, w2, b2)


if __name__ == "__main__":
    key = jax.random.PRNGKey(0)
    k0, k1, k2, k3 = jax.random.split(key, 4)

    # ---- case 1: small demo shape, single tile per axis ----------------------
    B, C, T, stride, K = 2, 16, 32, 2, 4
    x = jax.random.normal(k0, (B, C, T), jnp.float32)
    params = _make_params(k1, C, K)
    ref = _reference(x, params, stride=stride, kernel_size=K)
    U = (T - K) // stride + 1

    out_f32 = residual_downsample_block(x, params, stride=stride, kernel_size=K,
                                        compute_dtype=jnp.float32)
    out_f32 = jax.block_until_ready(out_f32)
    assert out_f32.shape == (B, C, U), out_f32.shape
    err = float(jnp.max(jnp.abs(out_f32 - ref)))
    assert err < 2e-3, err

    out_bf16 = residual_downsample_block(x, params, stride=stride, kernel_size=K,
                                         compute_dtype=jnp.bfloat16)
    out_bf16 = jax.block_until_ready(out_bf16)
    assert out_bf16.shape == (B, C, U), out_bf16.shape
    err = float(jnp.max(jnp.abs(out_bf16 - ref)))
    assert err < 1.5e-1, err

    # ---- case 2: multi-tile grid, odd stride, non-multiple T (mask path) -----
    B2, C2, T2, stride2 = 2, 24, 700, 3
    x2 = jax.random.normal(k2, (B2, C2, T2), jnp.float32)
    params2 = _make_params(k3, C2, K)
    ref2 = _reference(x2, params2, stride=stride2, kernel_size=K)
    U2 = (T2 - K) // stride2 + 1

    out2 = residual_downsample_block(x2, params2, stride=stride2, kernel_size=K,
                                     compute_dtype=jnp.float32, time_tile=256)
    out2 = jax.block_until_ready(out2)
    assert out2.shape == (B2, C2, U2), out2.shape
    err2 = float(jnp.max(jnp.abs(out2 - ref2)))
    assert err2 < 3e-3, err2

    print("KERNEL_OK")
</pallas_src>

<mosaic_0001>
module attributes {stable_mosaic.version = 11 : i64} {
  func.func @kernel(%arg0: i32, %arg1: i32, %arg2: memref<1x32x128xf32, #tpu.memory_space<vmem>>, %arg3: memref<1x8x128xf32, #tpu.memory_space<vmem>>, %arg4: memref<512x128xf32, #tpu.memory_space<vmem>>, %arg5: memref<1x1x2x128xf32, #tpu.memory_space<vmem>>, %arg6: memref<40x128xf32, #tpu.memory_space<vmem>>, %arg7: memref<32x512xf32, #tpu.memory_space<vmem>>) attributes {dimension_semantics = [#tpu.dimension_semantics<parallel>, #tpu.dimension_semantics<parallel>], iteration_bounds = array<i64: 2, 1>, scalar_prefetch = 0 : i64, scratch_operands = 2 : i64, tpu.core_type = #tpu.core_type<tc>, window_params = [{transform_indices = @transform_0, window_bounds = array<i64: 1, 32, 128>}, {transform_indices = @transform_1, window_bounds = array<i64: 1, 8, 128>}, {pipeline_mode = #tpu.pipeline_mode<synchronous>, transform_indices = @transform_2, window_bounds = array<i64: 512, 128>}, {transform_indices = @transform_3, window_bounds = array<i64: 1, 1, 2, 128>}]} {
    %c0 = arith.constant 0 : index
    %c0_0 = arith.constant 0 : index
    %c0_1 = arith.constant 0 : index
    %0 = vector.load %arg2[%c0, %c0_0, %c0_1] : memref<1x32x128xf32, #tpu.memory_space<vmem>>, vector<1x32x128xf32>
    %1 = vector.shape_cast %0 : vector<1x32x128xf32> to vector<32x128xf32>
    %c0_2 = arith.constant 0 : index
    %c0_3 = arith.constant 0 : index
    %2 = vector.load %arg6[%c0_2, %c0_3] : memref<40x128xf32, #tpu.memory_space<vmem>>, vector<32x128xf32>
    tpu.vector_store %arg6[%c0_2, %c0_3], %1 {strides = array<i32>} : memref<40x128xf32, #tpu.memory_space<vmem>>, vector<32x128xf32>,
    %c0_4 = arith.constant 0 : index
    %c0_5 = arith.constant 0 : index
    %c0_6 = arith.constant 0 : index
    %3 = vector.load %arg3[%c0_4, %c0_5, %c0_6] : memref<1x8x128xf32, #tpu.memory_space<vmem>>, vector<1x8x128xf32>
    %4 = vector.shape_cast %3 : vector<1x8x128xf32> to vector<8x128xf32>
    %c32 = arith.constant 32 : index
    %c0_7 = arith.constant 0 : index
    %5 = vector.load %arg6[%c32, %c0_7] : memref<40x128xf32, #tpu.memory_space<vmem>>, vector<8x128xf32>
    tpu.vector_store %arg6[%c32, %c0_7], %4 {strides = array<i32>} : memref<40x128xf32, #tpu.memory_space<vmem>>, vector<8x128xf32>,
    %c0_8 = arith.constant 0 : index
    %c0_9 = arith.constant 0 : index
    %6 = vector.load %arg6[%c0_8, %c0_9] : memref<40x128xf32, #tpu.memory_space<vmem>>, vector<32x128xf32>
    %c0_10 = arith.constant 0 : index
    %c0_11 = arith.constant 0 : index
    %7 = vector.load %arg7[%c0_10, %c0_11] : memref<32x512xf32, #tpu.memory_space<vmem>>, vector<32x128xf32>
    tpu.vector_store %arg7[%c0_10, %c0_11], %6 {strides = array<i32>} : memref<32x512xf32, #tpu.memory_space<vmem>>, vector<32x128xf32>,
    %c1 = arith.constant 1 : index
    %c0_12 = arith.constant 0 : index
    %8 = vector.load %arg6[%c1, %c0_12] : memref<40x128xf32, #tpu.memory_space<vmem>>, vector<32x128xf32>
    %c0_13 = arith.constant 0 : index
    %c128 = arith.constant 128 : index
    %9 = vector.load %arg7[%c0_13, %c128] : memref<32x512xf32, #tpu.memory_space<vmem>>, vector<32x128xf32>
    tpu.vector_store %arg7[%c0_13, %c128], %8 {strides = array<i32>} : memref<32x512xf32, #tpu.memory_space<vmem>>, vector<32x128xf32>,
    %c2 = arith.constant 2 : index
    %c0_14 = arith.constant 0 : index
    %10 = vector.load %arg6[%c2, %c0_14] : memref<40x128xf32, #tpu.memory_space<vmem>>, vector<32x128xf32>
    %c0_15 = arith.constant 0 : index
    %c256 = arith.constant 256 : index
    %11 = vector.load %arg7[%c0_15, %c256] : memref<32x512xf32, #tpu.memory_space<vmem>>, vector<32x128xf32>
    tpu.vector_store %arg7[%c0_15, %c256], %10 {strides = array<i32>} : memref<32x512xf32, #tpu.memory_space<vmem>>, vector<32x128xf32>,
    %c3 = arith.constant 3 : index
    %c0_16 = arith.constant 0 : index
    %12 = vector.load %arg6[%c3, %c0_16] : memref<40x128xf32, #tpu.memory_space<vmem>>, vector<32x128xf32>
    %c0_17 = arith.constant 0 : index
    %c384 = arith.constant 384 : index
    %13 = vector.load %arg7[%c0_17, %c384] : memref<32x512xf32, #tpu.memory_space<vmem>>, vector<32x128xf32>
    tpu.vector_store %arg7[%c0_17, %c384], %12 {strides = array<i32>} : memref<32x512xf32, #tpu.memory_space<vmem>>, vector<32x128xf32>,
    %c0_18 = arith.constant 0 : index
    %c0_19 = arith.constant 0 : index
    %14 = vector.load %arg7[%c0_18, %c0_19] : memref<32x512xf32, #tpu.memory_space<vmem>>, vector<32x512xf32>
    %c0_20 = arith.constant 0 : index
    %c0_21 = arith.constant 0 : index
    %15 = vector.load %arg4[%c0_20, %c0_21] : memref<512x128xf32, #tpu.memory_space<vmem>>, vector<512x128xf32>
    %cst = arith.constant dense<0.000000e+00> : vector<32x128xf32>
    %16 = tpu.matmul %14, %15, %cst {dimension_numbers = #tpu.dot_dimension_numbers<[1], [0], [0], [1], [0, 0, 1, 1], [], []>} : vector<32x512xf32>, vector<512x128xf32>, vector<32x128xf32> -> vector<32x128xf32>
    %c32_i32 = arith.constant 32 : i32
    %17 = arith.muli %arg1, %c32_i32 : i32
    %18 = tpu.iota {dimensions = array<i32: 0>} : vector<32x1xi32>
    %19 = vector.broadcast %17 : i32 to vector<32x1xi32>
    %20 = arith.addi %18, %19 : vector<32x1xi32>
    %c32_i32_22 = arith.constant 32 : i32
    %21 = vector.broadcast %c32_i32_22 : i32 to vector<32x1xi32>
    %22 = arith.cmpi slt, %20, %21 : vector<32x1xi32>
    %cst_23 = arith.constant 0.000000e+00 : f32
    %23 = vector.shape_cast %22 : vector<32x1xi1> to vector<32x1xi1>
    %24 = vector.broadcast %23 : vector<32x1xi1> to vector<32x128xi1>
    %25 = vector.broadcast %cst_23 : f32 to vector<32x128xf32>
    %26 = arith.select %24, %16, %25 : vector<32x128xi1>, vector<32x128xf32>
    %cst_24 = arith.constant dense<0.000000e+00> : vector<128xf32>
    %27 = vector.multi_reduction <add>, %26, %cst_24 [0] : vector<32x128xf32> to vector<128xf32>
    %28 = vector.shape_cast %27 : vector<128xf32> to vector<1x128xf32>
    %29 = arith.mulf %26, %26 : vector<32x128xf32>
    %cst_25 = arith.constant dense<0.000000e+00> : vector<128xf32>
    %30 = vector.multi_reduction <add>, %29, %cst_25 [0] : vector<32x128xf32> to vector<128xf32>
    %31 = vector.shape_cast %30 : vector<128xf32> to vector<1x128xf32>
    %32 = tpu.concatenate %28, %31 in 0 : vector<1x128xf32>, vector<1x128xf32> -> vector<2x128xf32>
    %33 = vector.shape_cast %32 : vector<2x128xf32> to vector<1x1x2x128xf32>
    %c0_26 = arith.constant 0 : index
    %c0_27 = arith.constant 0 : index
    %c0_28 = arith.constant 0 : index
    %c0_29 = arith.constant 0 : index
    %34 = vector.load %arg5[%c0_26, %c0_27, %c0_28, %c0_29] : memref<1x1x2x128xf32, #tpu.memory_space<vmem>>, vector<1x1x2x128xf32>
    tpu.vector_store %arg5[%c0_26, %c0_27, %c0_28, %c0_29], %33 {strides = array<i32>} : memref<1x1x2x128xf32, #tpu.memory_space<vmem>>, vector<1x1x2x128xf32>,
    return
  }
  func.func @transform_0(%arg0: i32, %arg1: i32) -> (i32, i32, i32) {
    %c0_i32 = arith.constant 0 : i32
    %c0_i32_0 = arith.constant 0 : i32
    return %arg0, %arg1, %c0_i32 : i32, i32, i32
  }
  func.func @transform_1(%arg0: i32, %arg1: i32) -> (i32, i32, i32) {
    %c1_i32 = arith.constant 1 : i32
    %0 = arith.addi %arg1, %c1_i32 : i32
    %c4_i32 = arith.constant 4 : i32
    %1 = arith.muli %0, %c4_i32 : i32
    %c0_i32 = arith.constant 0 : i32
    %c0_i32_0 = arith.constant 0 : i32
    return %arg0, %1, %c0_i32 : i32, i32, i32
  }
  func.func @transform_2(%arg0: i32, %arg1: i32) -> (i32, i32) {
    %c0_i32 = arith.constant 0 : i32
    %c0_i32_0 = arith.constant 0 : i32
    %c0_i32_1 = arith.constant 0 : i32
    return %c0_i32, %c0_i32_0 : i32, i32
  }
  func.func @transform_3(%arg0: i32, %arg1: i32) -> (i32, i32, i32, i32) {
    %c0_i32 = arith.constant 0 : i32
    %c0_i32_0 = arith.constant 0 : i32
    %c0_i32_1 = arith.constant 0 : i32
    return %arg0, %arg1, %c0_i32, %c0_i32_0 : i32, i32, i32, i32
  }
}

</mosaic_0001>

<bundles_post_ra>
// kernel: tpu_custom_call.1
= control target key start
LH: loop header
LB: loop body
LE: loop exit
PB: predicated region body
PF: predicated region fallthrough
CT: control target
= control target key end

     0   :  { %s1479_s0 = inlined_call_operand.hbm [shape: f32[2,40,128], index: 0, kind: input, shape index: {}]   ;;  %s1480_s1 = inlined_call_operand.hbm [shape: f32[2,40,128], index: 1, kind: input, shape index: {}]   ;;  %s1481_s2 = inlined_call_operand.hbm [shape: f32[512,128], index: 2, kind: input, shape index: {}]   ;;  %s1482_s3 = inlined_call_operand.hbm [shape: f32[2,1,2,128], index: 3, kind: output, shape index: {}]  }
   0x1   :  { %1489 = sst [smem:[#allocation17_spill]] %s1479_s0 }
   0x2   :  { %1490 = sst [smem:[#allocation18_spill]] %s1481_s2 }
   0x3   :  { %8 = vsyncpa [#allocation5], 0 }
   0x4   :  { %10 = vsyncpa [#allocation5 + $0x1], 0 }
   0x5   :  { %11 = vsyncpa [#allocation8], 0 }
   0x6   :  { %13 = vsyncpa [#allocation8 + $0x1], 0 }
   0x7   :  { %14 = vsyncpa [#allocation6], 0 }
   0x8   :  { %16 = vsyncpa [#allocation6 + $0x1], 0  ;;  %s1216_s12 = smov 0   ;;  %s1218_s13 = smov 0  }
   0x9   :  { %s1220_s14 = smov 0   ;;  %s1222_s15 = smov 0  }
   0xa   :  { %s1224_s16 = smov 0   ;;  %s1226_s17 = smov 0  }
   0xb LB: > { %s1247_s18 = sadd.s32 4294967295, %s1188_s17   ;;  %s759_s19 = sadd.s32 4294967294, %s1188_s17   ;;  %s1188_s17 = sphi %s1226_s17, %s22_s17   ;;  %s1184_s16 = sphi %s1224_s16, %s1517_s16   ;;  %s1180_s15 = sphi %s1222_s15, %s1516_s15   ;;  %s1176_s14 = sphi %s1220_s14, %s1515_s14   ;;  %s1172_s13 = sphi %s1218_s13, %s1514_s13   ;;  %s1168_s12 = sphi %s1216_s12, %s1513_s12  }
   0xc   : > { %p56_p0 = scmp.ne.s32.totalorder %s1172_s13, %s1168_s12  ;;  %p1483_p1 = scmp.eq.s32.totalorder %s1247_s18, 0 }
   0xd   : > { %p141_p3 = scmp.eq.s32.totalorder %s759_s19, 1  ;;  %p760_p5 = scmp.ge.s32.totalorder %s1188_s17, 1 }
   0xe   : > { %p1256_p4 = por %p1483_p1, %p56_p0  ;;  %p148_p7 = scmp.lt.s32.totalorder %s1188_s17, 3 }
   0xf   : > { %p1261_p6 = por %p141_p3, %p56_p0  ;;  %s1190_s23 = smov [#allocation9]  }
  0x10   : > { %s1491_s20 = scalar_select %p1256_p4, 1, 0 }
  0x11   : > { %s1492_s21 = scalar_select %p1261_p6, 1, 0 }
  0x12   : > { %p1266_p8 = pnand %p760_p5, %p148_p7  ;;  %s160_s24 = sshll.u32 %s1190_s23, 4  ;;  %s161_s24 = int_to_ptr.vmem [resolvable:$true] %s160_s24 }
  0x13   : > { %s34_s26 = sadd.s32 1, %s1184_s16  ;;  %s1495_s2 = sld [smem:[#allocation18_spill]] }
  0x14   : > { %s1493_s22 = scalar_select %p1266_p8, 1, 0 }
  0x15   : > { %p939_p9 = pneg %p1266_p8 }
  0x17   : > { %p1275_p11 = pnand %p939_p9, %p1483_p1 }
  0x19   : > { %s1009_s29 = scalar_lea.hbm %s1495_s2, 8192  ;;  %p1011_p13 = pneg %p1275_p11 }
  0x1a   : > { %p1010_p12 = scmp.ne.s32.totalorder %s1495_s2, %s1009_s29  ;;  %p1016_p5 = scmp.lt.u32.totalorder %s1009_s29, %s1495_s2 }
  0x1c   : > { %p1012_p0 = pnand %p1011_p13, %p1010_p12 }
  0x1e   : > { %p1013_p3 = pneg %p1012_p0 }
  0x20   : > { %p1018_p7 = pnand %p1016_p5, %p1013_p3 }
  0x22   : > { %1021 = shalt.err (!%p1018_p7)
}
  0x23   : > { %s1022_s7 = scalar_lea.vmem %s161_s24, 8192  ;;  %p1030_p2 = scmp.lt.s32.totalorder %s161_s24, %s161_s24 }
  0x24   : > { %p1023_p9 = scmp.ne.s32.totalorder %s161_s24, %s1022_s7  ;;  %p1031_p6 = scmp.lt.s32.totalorder %s1022_s7, %s1022_s7 }
  0x26   : > { %p1025_p10 = pnand %p1023_p9, %p1011_p13  ;;  %p1032_p4 = por %p1031_p6, %p1030_p2 }
  0x28   : > { %p1026_p1 = pneg %p1025_p10 }
  0x2a   : > { %p1033_p8 = pnand %p1032_p4, %p1026_p1 }
  0x2c   : > { %1036 = shalt.err (!%p1033_p8)
}
  0x2d   : > { %s1191_s8 = smov 128   ;;  %s1192_s9 = smov 8  }
  0x2e   : > { %942 = dma.hbm_to_vmem [thread:$0]  (!%p1275_p11), %s1495_s2, 8192, %s161_s24, [#allocation8], %s1191_s8, %s1191_s8, %s1192_s9  }
  0x2f   : > { %p36_p1 = scmp.ge.s32.totalorder %s34_s26, 2  ;;  %s43_s19 = sadd.s32 1, %s1176_s14 }
  0x30   : > { %p50_p2 = scmp.ne.s32.totalorder %s1176_s14, %s1172_s13  ;;  %p51_p4 = scmp.eq.s32.totalorder %s1188_s17, 0 }
  0x31   : > { %s1519_s26 = smov (%p36_p1, %s34_s26), 0  ;;  %p1497_p8 = scmp.eq.s32.totalorder %s1247_s18, 1 }
  0x32   : > { %1496 = sst [smem:[#allocation15_spill]] %s1519_s26  ;;  %p52_p6 = por %p51_p4, %p50_p2 }
  0x33   : > { %p1307_p10 = por %p1497_p8, %p50_p2  ;;  %s38_s25 = ssub.s32 %s1184_s16, %s1519_s26 }
  0x34   : > { %p955_p12 = scmp.lt.s32.totalorder %s1188_s17, 2  ;;  %p41_p13 = scmp.eq.s32.totalorder %s38_s25, 0 }
  0x35   : > { %s1498_s23 = scalar_select %p1307_p10, 1, 0 }
  0x36   : > { %s1315_s27 = sand.u32 1, %s1176_s14   ;;  %s1486_s29 = smul.u32 640, %s1184_s16 }
  0x37   : > { %s763_s24 = sshll.u32 %s1315_s27, 5  ;;  %p1322_p11 = pnand %p955_p12, %p52_p6 }
  0x38   : > { %s1319_s28 = scalar_select %p41_p13, %s1176_s14, %s43_s19  }
  0x39   : > { %s178_s30 = scalar_lea.vmem [#allocation4], %s763_s24  ;;  %s1501_s0 = sld [smem:[#allocation17_spill]] }
  0x3a   : > { %1499 = sst [smem:[#allocation16_spill]] %s1319_s28  ;;  %s193_s4 = sshll.u32 %s178_s30, 4  ;;  %s1333_s4 = int_to_ptr.vmem [resolvable:$true] %s193_s4 }
  0x3b   : > { %s175_s19 = scalar_lea.sflag [#allocation5], %s1315_s27  ;;  %p1039_p3 = pneg %p1322_p11 }
  0x3f   : > { %s1331_s10 = scalar_lea.hbm %s1501_s0, %s1486_s29  ;;  %s1042_s6 = scalar_lea.hbm %s1501_s0, 1280 }
  0x40   : > { %s1037_s25 = scalar_lea.hbm %s1331_s10, 512  ;;  %p1043_p9 = scmp.lt.u32.totalorder %s1331_s10, %s1501_s0 }
  0x41   : > { %p1038_p0 = scmp.ne.s32.totalorder %s1331_s10, %s1037_s25  ;;  %p1044_p1 = scmp.lt.u32.totalorder %s1042_s6, %s1037_s25 }
  0x42   : > { %p1046_p4 = scmp.lt.u32.totalorder %s1037_s25, %s1331_s10 }
  0x43   : > { %p1040_p5 = pnand %p1039_p3, %p1038_p0  ;;  %p1045_p2 = por %p1044_p1, %p1043_p9 }
  0x45   : > { %p1041_p7 = pneg %p1040_p5  ;;  %p1047_p6 = por %p1046_p4, %p1045_p2 }
  0x47   : > { %p1048_p8 = pnand %p1047_p6, %p1041_p7 }
  0x49   : > { %1051 = shalt.err (!%p1048_p8)
}
  0x4a   : > { %s1052_s11 = scalar_lea.vmem %s1333_s4, 512  ;;  %s1193_s24 = smov [#allocation4]  }
  0x4b   : > { %p1053_p12 = scmp.ne.s32.totalorder %s1333_s4, %s1052_s11  ;;  %s1057_s30 = sshll.u32 %s1193_s24, 4  ;;  %s1058_s30 = int_to_ptr.vmem [resolvable:$false] %s1057_s30 }
  0x4c   : > { %s1059_s29 = scalar_lea.vmem %s1058_s30, 1024  ;;  %p1060_p5 = scmp.lt.s32.totalorder %s1333_s4, %s1058_s30 }
  0x4d   : > { %p1055_p13 = pnand %p1053_p12, %p1039_p3  ;;  %p1061_p9 = scmp.lt.s32.totalorder %s1059_s29, %s1052_s11 }
  0x4f   : > { %p1056_p0 = pneg %p1055_p13  ;;  %p1062_p1 = por %p1061_p9, %p1060_p5 }
  0x51   : > { %p1063_p2 = pnand %p1062_p1, %p1056_p0 }
  0x53   : > { %1066 = shalt.err (!%p1063_p2)
}
  0x54   : > { %946 = dma.hbm_to_vmem [thread:$0]  (!%p1322_p11), %s1331_s10, 512, %s1333_s4, %s175_s19, %s1191_s8, %s1191_s8, %s1192_s9  }
  0x55   : > { %s765_s25 = sshll.u32 %s1315_s27, 3  ;;  %s1502_s6 = smul.u32 640, %s1184_s16 }
  0x56   : > { %s207_s29 = scalar_lea.vmem [#allocation7], %s765_s25  ;;  %s1503_s2 = sand.u32 1, %s1188_s17  }
  0x57   : > { %s682_s24 = scalar_lea.hbm %s1480_s1, %s1502_s6  ;;  %s218_s0 = sshll.u32 %s207_s29, 4  ;;  %s219_s0 = int_to_ptr.vmem [resolvable:$true] %s218_s0 }
  0x58   : > { %s1373_s30 = scalar_lea.hbm %s682_s24, 512  ;;  %s204_s26 = scalar_lea.sflag [#allocation8], %s1503_s2 }
  0x59   : > { %s1097_s28 = scalar_lea.hbm %s682_s24, 640  ;;  %s1072_s27 = scalar_lea.hbm %s1480_s1, 1280 }
  0x5a   : > { %p1068_p7 = scmp.ne.s32.totalorder %s1373_s30, %s1097_s28  ;;  %p1073_p8 = scmp.lt.u32.totalorder %s1373_s30, %s1480_s1 }
  0x5b   : > { %p1074_p12 = scmp.lt.u32.totalorder %s1072_s27, %s1097_s28  ;;  %p1076_p0 = scmp.lt.u32.totalorder %s1097_s28, %s1373_s30 }
  0x5c   : > { %p1070_p4 = pnand %p1068_p7, %p1039_p3 }
  0x5d   : > { %p1075_p13 = por %p1074_p12, %p1073_p8 }
  0x5e   : > { %p1071_p6 = pneg %p1070_p4 }
  0x5f   : > { %p1077_p5 = por %p1076_p0, %p1075_p13 }
  0x61   : > { %p1078_p9 = pnand %p1077_p5, %p1071_p6 }
  0x63   : > { %1081 = shalt.err (!%p1078_p9)
}
  0x64   : > { %s1082_s2 = scalar_lea.vmem %s219_s0, 128  ;;  %s1194_s19 = smov [#allocation7]  }
  0x65   : > { %p1083_p1 = scmp.ne.s32.totalorder %s219_s0, %s1082_s2  ;;  %s1087_s25 = sshll.u32 %s1194_s19, 4  ;;  %s1088_s25 = int_to_ptr.vmem [resolvable:$false] %s1087_s25 }
  0x66   : > { %s1089_s6 = scalar_lea.vmem %s1088_s25, 256  ;;  %p1090_p4 = scmp.lt.s32.totalorder %s219_s0, %s1088_s25 }
  0x67   : > { %p1085_p2 = pnand %p1083_p1, %p1039_p3  ;;  %p1091_p10 = scmp.lt.s32.totalorder %s1089_s6, %s1082_s2 }
  0x69   : > { %p1086_p7 = pneg %p1085_p2  ;;  %p1092_p8 = por %p1091_p10, %p1090_p4 }
  0x6b   : > { %p1093_p12 = pnand %p1092_p8, %p1086_p7 }
  0x6d   : > { %1096 = shalt.err (!%p1093_p12)
}
  0x6e   : > { %949 = dma.hbm_to_vmem [thread:$0]  (!%p1322_p11), %s1373_s30, 128, %s219_s0, %s204_s26  }
  0x6f   : > { %p1504_p6 = scmp.ne.s32.totalorder %s1493_s22, 0 }
  0x70   : > { %s1398_s28 = sand.u32 (!%p1504_p6), 1, %s1172_s13   ;;  %p1505_p10 = scmp.ne.s32.totalorder (!%p1504_p6), %s1491_s20, 0 }
  0x71   : > { %227 = sbr.rel (%p1504_p6) target bundleno = 424 (0x1a8), region = 32  ;;  %s768_s11 = sshll.u32 (!%p1504_p6), %s1398_s28, 5 }
  0x72   : > { %s230_s7 = scalar_lea.sflag (!%p1504_p6), [#allocation5], %s1398_s28  ;;  %s1402_s24 = scalar_lea.vmem (!%p1504_p6), [#allocation4], %s768_s11 }
  0x78   : > { %1151 = dma.done.wait (%p1505_p10), %s230_s7, 512  }
  0x79   : > { %1153 = vsyncadd (%p1505_p10), %s230_s7, 4294966784  ;;  %s238_s0 = sand.u32 1, %s1247_s18   ;;  %s769_s22 = sshll.u32 %s1398_s28, 3 }
  0x7a   : > { %s239_s26 = scalar_lea.sflag [#allocation8], %s238_s0  ;;  %s1410_s5 = scalar_lea.vmem [#allocation7], %s769_s22 }
  0x7b   : > { %1155 = dma.done.wait (%p1505_p10), %s239_s26, 128  }
  0x7c   : > { %1157 = vsyncadd (%p1505_p10), %s239_s26, 4294967168  ;;  %p1506_p11 = scmp.eq.s32.totalorder %s1247_s18, 0 }
  0x7e   : > { %1159 = dma.done.wait (%p1506_p11), [#allocation8], 8192   ;;  %p1507_p3 = pmov %p1506_p11 }
  0x7f   : > { %v355_v0 = vld [vmem:[#allocation9 + $0x80] sm:$0xff]  ;;  %v356_v1 = vld [vmem:[#allocation9 + $0x88] sm:$0xff]  ;;  %v357_v11 = vld [vmem:[#allocation9 + $0x90] sm:$0xff]  ;;  %s771_s18 = sshll.u32 %s1398_s28, 1  ;;  %s773_s20 = sshll.u32 %s1180_s15, 5  ;;  %vm622_vm0 = vcmask 1040384  }
  0x80   : > { %1161 = vsyncadd (%p1507_p3), [#allocation8], 4294959104  ;;  %v387_v2 = vld [vmem:[#allocation9 + $0x180] sm:$0xff]  ;;  %v864_v3 = vpack.c.bf16 %v356_v1, %v355_v0  ;;  %v388_v4 = vld [vmem:[#allocation9 + $0x188] sm:$0xff]  ;;  %s273_s30 = scalar_lea.vmem [#allocation10], %s771_s18  ;;  %s1430_s27 = scalar_lea.hbm %s1482_s3, %s773_s20 }
  0x81   : > { %v339_v5 = vld [vmem:[#allocation9] sm:$0xff]  ;;  %v340_v6 = vld [vmem:[#allocation9 + $0x8] sm:$0xff]  ;;  %v896_v7 = vpack.c.bf16 %v388_v4, %v387_v2  ;;  %v358_v13 = vld [vmem:[#allocation9 + $0x98] sm:$0xff]  ;;  %s640_s29 = sshll.u32 %s273_s30, 4  ;;  %s626_s4 = scalar_lea.sflag [#allocation6], %s1398_s28  ;;  %s1432_s29 = int_to_ptr.vmem [resolvable:$true] %s640_s29 }
  0x82   : > { %v866_v8 = vpack.c.bf16 %v340_v6, %v339_v5  ;;  %v371_v9 = vld [vmem:[#allocation9 + $0x100] sm:$0xff]  ;;  %v372_v10 = vld [vmem:[#allocation9 + $0x108] sm:$0xff]  ;;  %865 = vmatprep.subr.bf16.mxu0 %v864_v3  ;;  %v389_v14 = vld [vmem:[#allocation9 + $0x190] sm:$0xff]  ;;  %v868_v16 = vpack.c.bf16 %v358_v13, %v357_v11  ;;  %s1098_s10 = scalar_lea.vmem %s1432_s29, 32  ;;  %p1508_p0 = scmp.ne.s32.totalorder %s1498_s23, 0 }
  0x83   : > { %v898_v12 = vpack.c.bf16 %v372_v10, %v371_v9  ;;  %v390_v15 = vld [vmem:[#allocation9 + $0x198] sm:$0xff]  ;;  %897 = vmatprep.subr.bf16.mxu1 %v896_v7  ;;  %v341_v18 = vld [vmem:[#allocation9 + $0x10] sm:$0xff]  ;;  %v359_v23 = vld [vmem:[#allocation9 + $0xa0] sm:$0xff]  ;;  %p1099_p13 = scmp.ne.s32.totalorder %s1432_s29, %s1098_s10  ;;  %s1195_s15 = smov [#allocation10]  }
  0x84   : > { %867 = vmatpush3.bf16.msra.mxu0 %v866_v8  ;;  %v900_v17 = vpack.c.bf16 %v390_v15, %v389_v14  ;;  %v342_v19 = vld [vmem:[#allocation9 + $0x18] sm:$0xff]  ;;  %v373_v20 = vld [vmem:[#allocation9 + $0x110] sm:$0xff]  ;;  %v360_v24 = vld [vmem:[#allocation9 + $0xa8] sm:$0xff]  ;;  %s1102_s2 = sshll.u32 %s1195_s15, 4  ;;  %s1103_s2 = int_to_ptr.vmem [resolvable:$false] %s1102_s2 }
  0x85   : > { %899 = vmatpush3.bf16.msra.mxu1 %v898_v12  ;;  %v870_v21 = vpack.c.bf16 %v342_v19, %v341_v18  ;;  %v374_v22 = vld [vmem:[#allocation9 + $0x118] sm:$0xff]  ;;  %869 = vmatprep.subr.bf16.mxu0 %v868_v16  ;;  %v872_v26 = vpack.c.bf16 %v360_v24, %v359_v23  ;;  %v391_v27 = vld [vmem:[#allocation9 + $0x1a0] sm:$0xff]  ;;  %v392_v28 = vld [vmem:[#allocation9 + $0x1a8] sm:$0xff]  ;;  %p1100_p5 = pnand %p1099_p13, %p1508_p0  ;;  %s1104_s19 = scalar_lea.vmem %s1103_s2, 64 }
  0x86   : > { %901 = vmatprep.subr.bf16.mxu1 %v900_v17  ;;  %v902_v25 = vpack.c.bf16 %v374_v22, %v373_v20  ;;  %v343_v29 = vld [vmem:[#allocation9 + $0x20] sm:$0xff]  ;;  %v904_v30 = vpack.c.bf16 %v392_v28, %v391_v27  ;;  %v344_v31 = vld [vmem:[#allocation9 + $0x28] sm:$0xff]  ;;  %v361_v35 = vld [vmem:[#allocation9 + $0xb0] sm:$0xff]  ;;  %p1105_p1 = scmp.lt.s32.totalorder %s1432_s29, %s1103_s2  ;;  %p1106_p2 = scmp.lt.s32.totalorder %s1104_s19, %s1098_s10 }
  0x87   : > { %v375_v32 = vld [vmem:[#allocation9 + $0x120] sm:$0xff]  ;;  %v376_v33 = vld [vmem:[#allocation9 + $0x128] sm:$0xff]  ;;  %v874_v34 = vpack.c.bf16 %v344_v31, %v343_v29  ;;  %v362_v36 = vld [vmem:[#allocation9 + $0xb8] sm:$0xff]  ;;  %p1101_p9 = pneg %p1100_p5 }
  0x88   : > { %871 = vmatpush3.bf16.msra.mxu0 %v870_v21  ;;  %v393_v37 = vld [vmem:[#allocation9 + $0x1b0] sm:$0xff]  ;;  %v906_v38 = vpack.c.bf16 %v376_v33, %v375_v32  ;;  %v876_v39 = vpack.c.bf16 %v362_v36, %v361_v35  ;;  %v394_v40 = vld [vmem:[#allocation9 + $0x1b8] sm:$0xff]  ;;  %v363_v46 = vld [vmem:[#allocation9 + $0xc0] sm:$0xff]  ;;  %p1107_p7 = por %p1106_p2, %p1105_p1 }
  0x89   : > { %903 = vmatpush3.bf16.msra.mxu1 %v902_v25  ;;  %873 = vmatprep.subr.bf16.mxu0 %v872_v26  ;;  %v345_v41 = vld [vmem:[#allocation9 + $0x30] sm:$0xff]  ;;  %v346_v42 = vld [vmem:[#allocation9 + $0x38] sm:$0xff]  ;;  %v908_v43 = vpack.c.bf16 %v394_v40, %v393_v37  ;;  %v364_v47 = vld [vmem:[#allocation9 + $0xc8] sm:$0xff] }
  0x8a   : > { %905 = vmatprep.subr.bf16.mxu1 %v904_v30  ;;  %v377_v44 = vld [vmem:[#allocation9 + $0x130] sm:$0xff]  ;;  %v378_v45 = vld [vmem:[#allocation9 + $0x138] sm:$0xff]  ;;  %v395_v48 = vld [vmem:[#allocation9 + $0x1c0] sm:$0xff]  ;;  %v878_v50 = vpack.c.bf16 %v346_v42, %v345_v41  ;;  %v880_v52 = vpack.c.bf16 %v364_v47, %v363_v46  ;;  %p1108_p4 = pnand %p1107_p7, %p1101_p9 }
  0x8b   : > { %v396_v49 = vld [vmem:[#allocation9 + $0x1c8] sm:$0xff]  ;;  %v910_v51 = vpack.c.bf16 %v378_v45, %v377_v44  ;;  %v347_v53 = vld [vmem:[#allocation9 + $0x40] sm:$0xff]  ;;  %v365_v58 = vld [vmem:[#allocation9 + $0xd0] sm:$0xff] }
  0x8c   : > { %875 = vmatpush3.bf16.msra.mxu0 %v874_v34  ;;  %v348_v54 = vld [vmem:[#allocation9 + $0x48] sm:$0xff]  ;;  %v379_v55 = vld [vmem:[#allocation9 + $0x140] sm:$0xff]  ;;  %v912_v56 = vpack.c.bf16 %v396_v49, %v395_v48  ;;  %v366_v59 = vld [vmem:[#allocation9 + $0xd8] sm:$0xff] }
  0x8d   : > { %907 = vmatpush3.bf16.msra.mxu1 %v906_v38  ;;  %877 = vmatprep.subr.bf16.mxu0 %v876_v39  ;;  %v380_v57 = vld [vmem:[#allocation9 + $0x148] sm:$0xff]  ;;  %v397_v60 = vld [vmem:[#allocation9 + $0x1d0] sm:$0xff]  ;;  %v398_v61 = vld [vmem:[#allocation9 + $0x1d8] sm:$0xff]  ;;  %v882_v62 = vpack.c.bf16 %v348_v54, %v347_v53  ;;  %v884_v1 = vpack.c.bf16 %v366_v59, %v365_v58 }
  0x8e   : > { %909 = vmatprep.subr.bf16.mxu1 %v908_v43  ;;  %v349_v63 = vld [vmem:[#allocation9 + $0x50] sm:$0xff]  ;;  %v914_v0 = vpack.c.bf16 %v380_v57, %v379_v55  ;;  %v350_v2 = vld [vmem:[#allocation9 + $0x58] sm:$0xff]  ;;  %v916_v5 = vpack.c.bf16 %v398_v61, %v397_v60  ;;  %v367_v6 = vld [vmem:[#allocation9 + $0xe0] sm:$0xff] }
  0x8f   : > { %v381_v3 = vld [vmem:[#allocation9 + $0x150] sm:$0xff]  ;;  %v382_v4 = vld [vmem:[#allocation9 + $0x158] sm:$0xff]  ;;  %v368_v7 = vld [vmem:[#allocation9 + $0xe8] sm:$0xff]  ;;  %v886_v12 = vpack.c.bf16 %v350_v2, %v349_v63 }
  0x90   : > { %879 = vmatpush3.bf16.msra.mxu0 %v878_v50  ;;  %v399_v8 = vld [vmem:[#allocation9 + $0x1e0] sm:$0xff]  ;;  %v400_v9 = vld [vmem:[#allocation9 + $0x1e8] sm:$0xff]  ;;  %v369_v15 = vld [vmem:[#allocation9 + $0xf0] sm:$0xff]  ;;  %v918_v16 = vpack.c.bf16 %v382_v4, %v381_v3  ;;  %v888_v17 = vpack.c.bf16 %v368_v7, %v367_v6 }
  0x91   : > { %911 = vmatpush3.bf16.msra.mxu1 %v910_v51  ;;  %881 = vmatprep.subr.bf16.mxu0 %v880_v52  ;;  %v351_v10 = vld [vmem:[#allocation9 + $0x60] sm:$0xff]  ;;  %v352_v11 = vld [vmem:[#allocation9 + $0x68] sm:$0xff]  ;;  %v370_v18 = vld [vmem:[#allocation9 + $0xf8] sm:$0xff]  ;;  %v920_v21 = vpack.c.bf16 %v400_v9, %v399_v8 }
  0x92   : > { %913 = vmatprep.subr.bf16.mxu1 %v912_v56  ;;  %v383_v13 = vld [vmem:[#allocation9 + $0x160] sm:$0xff]  ;;  %v384_v14 = vld [vmem:[#allocation9 + $0x168] sm:$0xff]  ;;  %v281_v19 = vld [vmem:[%s1402_s24] sm:$0xff]  ;;  %v890_v27 = vpack.c.bf16 %v352_v11, %v351_v10  ;;  %v892_v29 = vpack.c.bf16 %v370_v18, %v369_v15 }
  0x93   : > { %v282_v20 = vld [vmem:[%s1402_s24 + $0x8] sm:$0xff]  ;;  %285 = vst [vmem:[#allocation2] sm:$0xff] %v281_v19  ;;  %v283_v22 = vld [vmem:[%s1402_s24 + $0x10] sm:$0xff]  ;;  %v284_v23 = vld [vmem:[%s1402_s24 + $0x18] sm:$0xff]  ;;  %v922_v28 = vpack.c.bf16 %v384_v14, %v383_v13 }
  0x94   : > { %883 = vmatpush3.bf16.msra.mxu0 %v882_v62  ;;  %286 = vst [vmem:[#allocation2 + $0x8] sm:$0xff] %v282_v20  ;;  %v289_v24 = vld [vmem:[%s1410_s5] sm:$0xff]  ;;  %287 = vst [vmem:[#allocation2 + $0x10] sm:$0xff] %v283_v22 }
  0x95   : > { %915 = vmatpush3.bf16.msra.mxu1 %v914_v0  ;;  %885 = vmatprep.subr.bf16.mxu0 %v884_v1  ;;  %v401_v25 = vld [vmem:[#allocation9 + $0x1f0] sm:$0xff]  ;;  %v402_v26 = vld [vmem:[#allocation9 + $0x1f8] sm:$0xff]  ;;  %288 = vst [vmem:[#allocation2 + $0x18] sm:$0xff] %v284_v23  ;;  %290 = vst [vmem:[#allocation2 + $0x20] sm:$0xff] %v289_v24 }
  0x96   : > { %917 = vmatprep.subr.bf16.mxu1 %v916_v5  ;;  %v353_v30 = vld [vmem:[#allocation9 + $0x70] sm:$0xff]  ;;  %v354_v31 = vld [vmem:[#allocation9 + $0x78] sm:$0xff]  ;;  %v924_v32 = vpack.c.bf16 %v402_v26, %v401_v25 }
  0x97   : > { %v385_v33 = vld [vmem:[#allocation9 + $0x170] sm:$0xff]  ;;  %v386_v34 = vld [vmem:[#allocation9 + $0x178] sm:$0xff]  ;;  %v894_v35 = vpack.c.bf16 %v354_v31, %v353_v30 }
  0x98   : > { %887 = vmatpush3.bf16.msra.mxu0 %v886_v12  ;;  %v926_v36 = vpack.c.bf16 %v386_v34, %v385_v33 }
  0x99   : > { %919 = vmatpush3.bf16.msra.mxu1 %v918_v16  ;;  %889 = vmatprep.subr.bf16.mxu0 %v888_v17 }
  0x9a   : > { %921 = vmatprep.subr.bf16.mxu1 %v920_v21 }
  0x9b   : > { %v299_v37 = vld [vmem:[#allocation2 + $0x1] sm:$0xff]  ;;  %v300_v40 = vld [vmem:[#allocation2 + $0x9] sm:$0xff] }
  0x9c   : > { %891 = vmatpush3.bf16.msra.mxu0 %v890_v27  ;;  %v315_v38 = vld [vmem:[#allocation2 + $0x3] sm:$0xff]  ;;  %467 = vmatprep.mubr.f32.mxu0 %v299_v37  ;;  %v316_v41 = vld [vmem:[#allocation2 + $0xb] sm:$0xff]  ;;  %v317_v44 = vld [vmem:[#allocation2 + $0x13] sm:$0xff] }
  0x9d   : > { %923 = vmatpush3.bf16.msra.mxu1 %v922_v28  ;;  %893 = vmatprep.subr.bf16.mxu0 %v892_v29  ;;  %v307_v39 = vld [vmem:[#allocation2 + $0x2] sm:$0xff]  ;;  %v308_v42 = vld [vmem:[#allocation2 + $0xa] sm:$0xff]  ;;  %v309_v45 = vld [vmem:[#allocation2 + $0x12] sm:$0xff] }
  0x9e   : > { %925 = vmatprep.subr.bf16.mxu1 %v924_v32  ;;  %552 = vmatprep.mubr.f32.mxu1 %v315_v38  ;;  %v301_v43 = vld [vmem:[#allocation2 + $0x11] sm:$0xff]  ;;  %v302_v46 = vld [vmem:[#allocation2 + $0x19] sm:$0xff] }
  0x9f   : > { %v318_v47 = vld [vmem:[#allocation2 + $0x1b] sm:$0xff] }
  0xa0   : > { %895 = vmatpush3.bf16.msra.mxu0 %v894_v35  ;;  %v310_v48 = vld [vmem:[#allocation2 + $0x1a] sm:$0xff] }
  0xa1   : > { %927 = vmatpush3.bf16.msra.mxu1 %v926_v36 }
  0xa3   : > { %468 = vmatmul.mubr.f32.vlgmr.msra.gmra.mrb[0].mxu0 %v281_v19 }
  0xa4   : > { %553 = vmatmul.mubr.f32.vlgmr.msra.gmra.mrb[0].mxu1 %v307_v39  ;;  %472 = vmatprep.mubr.f32.mxu0 %v300_v40 }
  0xa5   : > { %557 = vmatprep.mubr.f32.mxu1 %v316_v41 }
  0xa7   : > { %473 = vmatmul.mubr.f32.gmra.mrb[2].mxu0 %v282_v20 }
  0xa8   : > { %558 = vmatmul.mubr.f32.gmra.mrb[2].mxu1 %v308_v42  ;;  %477 = vmatprep.mubr.f32.mxu0 %v301_v43 }
  0xa9   : > { %562 = vmatprep.mubr.f32.mxu1 %v317_v44 }
  0xab   : > { %478 = vmatmul.mubr.f32.gmra.mrb[4].mxu0 %v283_v22 }
  0xac   : > { %563 = vmatmul.mubr.f32.gmra.mrb[4].mxu1 %v309_v45  ;;  %482 = vmatprep.mubr.f32.mxu0 %v302_v46 }
  0xad   : > { %567 = vmatprep.mubr.f32.mxu1 %v318_v47 }
  0xaf   : > { %483 = vmatmul.mubr.f32.gmra.mrb[6].mxu0 %v284_v23 }
  0xb0   : > { %568 = vmatmul.mubr.f32.gmra.mrb[6].mxu1 %v310_v48 }
 0x176   : > { %v808_v49 = vpop.f32.mrb[0].mxu0 }
 0x177   : > { %v852_v50 = vpop.f32.mrb[0].mxu1  ;;  %v809_v51 = vpop.f32.mrb[1].mxu0 }
 0x178   : > { %v810_v52 = vadd.f32 %v809_v51, %v808_v49  ;;  %v853_v53 = vpop.f32.mrb[1].mxu1 }
 0x179   : > { %v854_v54 = vadd.f32 %v853_v53, %v852_v50 }
 0x17a   : > { %v811_v55 = vpop.f32.mrb[2].mxu0 }
 0x17b   : > { %v555_v56 = vadd.f32 %v854_v54, %v810_v52  ;;  %v855_v57 = vpop.f32.mrb[2].mxu1  ;;  %v812_v58 = vpop.f32.mrb[3].mxu0 }
 0x17c   : > { %v813_v59 = vadd.f32 %v812_v58, %v811_v55  ;;  %v856_v60 = vpop.f32.mrb[3].mxu1 }
 0x17d   : > { %v857_v61 = vadd.f32 %v856_v60, %v855_v57  ;;  %v609_v4 = vmul.f32 %v555_v56, %v555_v56 }
 0x17e   : > { %v814_v62 = vpop.f32.mrb[4].mxu0 }
 0x17f   : > { %v560_v63 = vadd.f32 %v857_v61, %v813_v59  ;;  %v858_v0 = vpop.f32.mrb[4].mxu1  ;;  %v815_v1 = vpop.f32.mrb[5].mxu0 }
 0x180   : > { %v816_v2 = vadd.f32 %v815_v1, %v814_v62  ;;  %v859_v3 = vpop.f32.mrb[5].mxu1 }
 0x181   : > { %v600_v5 = vadd.f32 %v560_v63, %v555_v56  ;;  %v610_v6 = vmul.f32 %v560_v63, %v560_v63  ;;  %v860_v7 = vadd.f32 %v859_v3, %v858_v0 }
 0x182   : > { %v817_v8 = vpop.f32.mrb[6].mxu0 }
 0x183   : > { %v613_v9 = vadd.f32 %v610_v6, %v609_v4  ;;  %v565_v10 = vadd.f32 %v860_v7, %v816_v2  ;;  %v861_v11 = vpop.f32.mrb[6].mxu1  ;;  %v818_v12 = vpop.f32.mrb[7].mxu0 }
 0x184   : > { %v819_v13 = vadd.f32 %v818_v12, %v817_v8  ;;  %v862_v14 = vpop.f32.mrb[7].mxu1 }
 0x185   : > { %v601_v15 = vadd.f32 %v600_v5, %v565_v10  ;;  %v611_v16 = vmul.f32 %v565_v10, %v565_v10  ;;  %v863_v17 = vadd.f32 %v862_v14, %v861_v11 }
 0x187   : > { %v614_v18 = vadd.f32 %v613_v9, %v611_v16  ;;  %v570_v19 = vadd.f32 %v863_v17, %v819_v13 }
 0x189   : > { %v602_v20 = vadd.f32 %v601_v15, %v570_v19  ;;  %v612_v21 = vmul.f32 %v570_v19, %v570_v19 }
 0x18b   : > { %v603_v22 = vrot.slane %v602_v20, 4  ;;  %v615_v23 = vadd.f32 %v614_v18, %v612_v21 }
 0x18d   : > { %v604_v24 = vadd.f32 %v603_v22, %v602_v20  ;;  %v616_v25 = vrot.slane %v615_v23, 4 }
 0x18f   : > { %v605_v26 = vrot.slane %v604_v24, 2  ;;  %v617_v27 = vadd.f32 %v616_v25, %v615_v23 }
 0x191   : > { %v606_v28 = vadd.f32 %v605_v26, %v604_v24  ;;  %v618_v29 = vrot.slane %v617_v27, 2 }
 0x193   : > { %v607_v30 = vrot.slane %v606_v28, 1  ;;  %v619_v31 = vadd.f32 %v618_v29, %v617_v27 }
 0x195   : > { %v620_v32 = vrot.slane %v619_v31, 1  ;;  %v608_v33 = vadd.f32 %v607_v30, %v606_v28 }
 0x197   : > { %v621_v34 = vadd.f32 %v620_v32, %v619_v31 }
 0x199   : > { %v623_v35 = vsel %vm622_vm0, %v608_v33, %v621_v34 }
 0x19a   : > { %624 = vst [vmem:[%s273_s30] sm:$0x3] %v623_v35 }
 0x19b   : > { %1111 = shalt.err (!%p1108_p4)
}
 0x19c   : > { %s1112_s25 = scalar_lea.hbm %s1430_s27, 32  ;;  %s1116_s11 = scalar_lea.hbm %s1482_s3, 64 }
 0x19d   : > { %p1113_p8 = scmp.ne.s32.totalorder %s1430_s27, %s1112_s25  ;;  %p1117_p10 = scmp.lt.u32.totalorder %s1430_s27, %s1482_s3 }
 0x19e   : > { %p1118_p11 = scmp.lt.u32.totalorder %s1116_s11, %s1112_s25  ;;  %p1120_p13 = scmp.lt.u32.totalorder %s1112_s25, %s1430_s27 }
 0x19f   : > { %p1114_p12 = pnand %p1113_p8, %p1508_p0 }
 0x1a0   : > { %p1119_p3 = por %p1118_p11, %p1117_p10 }
 0x1a1   : > { %p1115_p6 = pneg %p1114_p12 }
 0x1a2   : > { %p1121_p5 = por %p1120_p13, %p1119_p3 }
 0x1a4   : > { %p1122_p9 = pnand %p1121_p5, %p1115_p6 }
 0x1a6   : > { %1125 = shalt.err (!%p1122_p9)
}
 0x1a7   : > { %937 = dma.vmem_to_hbm [thread:$0]  (%p1508_p0), %s1432_s29, 32, %s1430_s27, %s626_s4  }
 0x1a8 PF: > { %s652_s0 = sand.u32 1, %s1168_s12   ;;  %p1509_p1 = scmp.ne.s32.totalorder %s1492_s21, 0 }
 0x1a9   : > { %p1510_p2 = scmp.ge.s32.totalorder %s1188_s17, 2  ;;  %s653_s22 = scalar_lea.sflag [#allocation6], %s652_s0 }
 0x1ab   : > { %p951_p7 = pnand %p1510_p2, %p1509_p1 }
 0x1ad   : > { %1163 = dma.done.wait (!%p951_p7), %s653_s22, 32  }
 0x1ae   : > { %1165 = vsyncadd (!%p951_p7), %s653_s22, 4294967264  ;;  %s22_s17 = sadd.s32 1, %s1188_s17   ;;  %s1511_s23 = sld [smem:[#allocation16_spill]] }
 0x1af   : > { %p19_p4 = scmp.ge.s32.totalorder %s22_s17, 4   ;;  %s1512_s26 = sld [smem:[#allocation15_spill]] }
 0x1b0   : > { %s1513_s12 = smov %s1172_s13  ;;  %s1514_s13 = smov %s1176_s14 }
 0x1b1   : > { %s1516_s15 = smov %s1184_s16  ;;  %21 = sbr.rel (!%p19_p4) target bundleno = 11 (0xb), region = 94 }
 0x1b4   : > { %s1515_s14 = smov %s1511_s23 }
 0x1b5   : > { %s1517_s16 = smov %s1512_s26 }
 0x1b8   :  { %658 = vsyncpa [#allocation5], 1 }
 0x1b9   :  { %660 = vsyncpa [#allocation5 + $0x1], 1 }
 0x1ba   :  { %661 = vsyncpa [#allocation8], 1 }
 0x1bb   :  { %663 = vsyncpa [#allocation8 + $0x1], 1 }
 0x1bc   :  { %664 = vsyncpa [#allocation6], 1 }
 0x1bd   :  { %666 = vsyncpa [#allocation6 + $0x1], 1 }

</bundles_post_ra>
